<compile_context>
chip_gen: v5e
topology: v5e:2x2
jax: 0.10.0
libtpu: 0.0.40
codegen_flags: <defaults>
</compile_context>

<pallas_src>
import functools

import jax
import jax.numpy as jnp
from jax import lax
from jax.experimental import pallas as pl
from jax.experimental.pallas import tpu as pltpu


def _round_up(x, m):
    return ((x + m - 1) // m) * m


def _pick_time_chunk(T, target_steps=4, max_chunk=32):
    """Largest divisor of T (<= max_chunk) that keeps >= target_steps grid steps."""
    best = 1
    for c in range(1, min(T, max_chunk) + 1):
        if T % c == 0 and T // c >= min(target_steps, T):
            best = c
    return best


def _vmem_limit_bytes():
    """Per-generation scoped-VMEM budget: 3/4 of physical, capped at 100 MiB.

    v5e/v6e: 128 MiB physical -> 96 MiB; v7x: 64 MiB physical -> 48 MiB.
    Falls back to a v7x-safe 48 MiB if the hardware query is unavailable.
    """
    try:
        cap = int(pltpu.get_tpu_info().vmem_capacity_bytes)
    except Exception:  # unknown chip / emulation
        cap = 64 * 1024 * 1024
    return int(max(min(cap * 3 // 4, 100 * 1024 * 1024), 32 * 1024 * 1024))


# ----------------------------------------------------------------------------
# Fused recurrence + FC kernel.  One grid step per TIME CHUNK (serial axis).
#
#   h_t      = tanh(P_t + h_{t-1} @ W_hh^T)      (P precomputed via the folded
#                                                 embedding table)
#   logits_t = h_t @ W_fc^T + b_fc               (per-chunk MXU epilogue)
#
# The carried hidden state lives in a VMEM scratch; the per-chunk hidden
# sequence lives in a second VMEM scratch and never touches HBM.
# ----------------------------------------------------------------------------
def rnn_fc_fused_kernel(p_ref, h0_ref, whh_ref, wfc_ref, bfc_ref,
                        logits_ref, hN_ref, h_carry, hseq):
    c = pl.program_id(0)
    tc, Bp, Hp = p_ref.shape
    Op = logits_ref.shape[-1]

    @pl.when(c == 0)
    def _():
        h_carry[...] = h0_ref[...]

    whh = whh_ref[...]                       # (Hp, Hp) bf16, hoisted out of loop

    def step(t, h):
        pre = p_ref[t] + jnp.dot(h.astype(jnp.bfloat16), whh,
                                 preferred_element_type=jnp.float32)
        h_new = jnp.tanh(pre)                # f32 on the EUP
        hseq[t] = h_new                      # stays in VMEM, never hits HBM
        return h_new

    # Serial dot->tanh chain: cap the unroll at 8 (no extra ILP beyond that,
    # only vreg pressure / code bloat).
    h_final = lax.fori_loop(0, tc, step, h_carry[...], unroll=min(tc, 8))
    h_carry[...] = h_final

    # FC head fused as a per-chunk epilogue: one (tc*Bp, Hp) @ (Hp, Op) matmul.
    h_flat = hseq[...].reshape(tc * Bp, Hp).astype(jnp.bfloat16)
    logits = jnp.dot(h_flat, wfc_ref[...],
                     preferred_element_type=jnp.float32) + bfc_ref[...]
    logits_ref[...] = logits.reshape(tc, Bp, Op).astype(logits_ref.dtype)

    @pl.when(c == pl.num_programs(0) - 1)
    def _():
        hN_ref[...] = h_final


def rnn_fc_fused(p_tm, h0, whh_t, wfc_t, b_fc):
    """p_tm: (T, Bp, Hp) f32 folded-embedding projection (time-major),
       h0: (Bp, Hp) f32, whh_t: (Hp, Hp) bf16, wfc_t: (Hp, Op) bf16,
       b_fc: (1, Op) f32  ->  (logits (T, Bp, Op) f32, h_n (Bp, Hp) f32)."""
    T, Bp, Hp = p_tm.shape
    Op = wfc_t.shape[1]
    tc = _pick_time_chunk(T)

    return pl.pallas_call(
        rnn_fc_fused_kernel,
        out_shape=(jax.ShapeDtypeStruct((T, Bp, Op), jnp.float32),
                   jax.ShapeDtypeStruct((Bp, Hp), jnp.float32)),
        grid_spec=pltpu.PrefetchScalarGridSpec(
            num_scalar_prefetch=0,
            grid=(T // tc,),
            in_specs=[
                pl.BlockSpec((tc, Bp, Hp), lambda c: (c, 0, 0)),  # P chunk (streamed)
                pl.BlockSpec((Bp, Hp), lambda c: (0, 0)),          # h0 (resident)
                pl.BlockSpec((Hp, Hp), lambda c: (0, 0)),          # W_hh^T bf16
                pl.BlockSpec((Hp, Op), lambda c: (0, 0)),          # W_fc^T bf16
                pl.BlockSpec((1, Op), lambda c: (0, 0)),           # b_fc
            ],
            out_specs=[
                pl.BlockSpec((tc, Bp, Op), lambda c: (c, 0, 0)),   # logits chunk
                pl.BlockSpec((Bp, Hp), lambda c: (0, 0)),          # final hidden
            ],
            scratch_shapes=[
                pltpu.VMEM((Bp, Hp), jnp.float32),      # carried hidden state
                pltpu.VMEM((tc, Bp, Hp), jnp.float32),  # per-chunk hidden sequence
            ],
        ),
        compiler_params=pltpu.CompilerParams(
            dimension_semantics=("arbitrary",),      # recurrence: must stay serial
            vmem_limit_bytes=_vmem_limit_bytes()),
    )(p_tm, h0, whh_t, wfc_t, b_fc)


def char_rnn_forward(params, x_tokens, hidden_state):
    """Replicates CharRNN.forward (num_layers=1).

    x_tokens:     (B, T) int32 token ids
    hidden_state: (1, B, H) float32
    returns:      (logits (B*T, O), new_hidden (1, B, H))
    """
    B, T = x_tokens.shape
    H = params["w_ih"].shape[0]
    O = params["w_fc"].shape[0]

    Hp = _round_up(H, 128)     # lane-dense hidden dim
    Op = _round_up(O, 128)     # lane-dense logits dim
    Bp = _round_up(B, 8)       # sublane-aligned batch

    f32 = jnp.float32

    # --- fold the input projection into the embedding table (jit constants) --
    #   P_t = emb[x_t] @ W_ih^T + b_ih + b_hh  ==  (emb @ W_ih^T + b)[x_t]
    emb_proj = (params["embedding"].astype(f32) @ params["w_ih"].T.astype(f32)
                + params["b_ih"] + params["b_hh"])               # (V, H) f32
    emb_proj = jnp.pad(emb_proj, ((0, 0), (0, Hp - H)))          # (V, Hp)

    whh_t = jnp.pad(params["w_hh"],
                    ((0, Hp - H), (0, Hp - H))).T.astype(jnp.bfloat16)
    wfc_t = jnp.pad(params["w_fc"],
                    ((0, Op - O), (0, Hp - H))).T.astype(jnp.bfloat16)
    b_fc = jnp.pad(params["b_fc"], (0, Op - O)).reshape(1, Op).astype(f32)

    # --- time-major gather of the pre-projected embedding ------------------
    p_tm = jnp.take(emb_proj, x_tokens.T, axis=0)                # (T, B, Hp)
    p_tm = jnp.pad(p_tm, ((0, 0), (0, Bp - B), (0, 0)))          # (T, Bp, Hp)
    # Padded batch rows carry P = 0 and h0 = 0, so they stay exactly 0.

    h0 = jnp.pad(hidden_state[0].astype(f32),
                 ((0, Bp - B), (0, Hp - H)))                     # (Bp, Hp)

    # --- fused serial recurrence + FC head ----------------------------------
    logits_tm, h_n_pad = rnn_fc_fused(p_tm, h0, whh_t, wfc_t, b_fc)

    # --- only the small logits tensor is re-ordered to batch-first ----------
    logits = logits_tm[:, :B, :O]                                # strip padding
    logits = jnp.transpose(logits, (1, 0, 2)).reshape(B * T, O)  # batch-first

    h_n = h_n_pad[:B, :H].reshape(1, B, H)
    return logits, h_n


def init_params(key, vocab_size, hidden_dim, output_dim):
    ks = jax.random.split(key, 7)
    s = 1.0 / jnp.sqrt(hidden_dim)
    return {
        "embedding": jax.random.normal(ks[0], (vocab_size, hidden_dim),
                                       jnp.float32),
        "w_ih": jax.random.uniform(ks[1], (hidden_dim, hidden_dim),
                                   jnp.float32, -s, s),
        "w_hh": jax.random.uniform(ks[2], (hidden_dim, hidden_dim),
                                   jnp.float32, -s, s),
        "b_ih": jax.random.uniform(ks[3], (hidden_dim,), jnp.float32, -s, s),
        "b_hh": jax.random.uniform(ks[4], (hidden_dim,), jnp.float32, -s, s),
        "w_fc": jax.random.uniform(ks[5], (output_dim, hidden_dim),
                                   jnp.float32, -s, s),
        "b_fc": jax.random.uniform(ks[6], (output_dim,), jnp.float32, -s, s),
    }


if __name__ == "__main__":
    vocab_size, hidden_dim, output_dim = 64, 32, 64
    batch, seq = 2, 8

    key = jax.random.PRNGKey(0)
    pkey, xkey = jax.random.split(key)
    params = init_params(pkey, vocab_size, hidden_dim, output_dim)

    x_tokens = jax.random.randint(xkey, (batch, seq), 0, vocab_size,
                                  dtype=jnp.int32)
    hidden0 = jnp.zeros((1, batch, hidden_dim), jnp.float32)  # init_hidden()

    logits, h_n = jax.jit(functools.partial(char_rnn_forward, params))(
        x_tokens, hidden0)
    jax.block_until_ready((logits, h_n))

    assert logits.shape == (batch * seq, output_dim)
    assert h_n.shape == (1, batch, hidden_dim)
    print("KERNEL_OK")
</pallas_src>

<mosaic_0001>
module attributes {stable_mosaic.version = 11 : i64} {
  func.func @rnn_fc_fused_kernel(%arg0: i32, %arg1: memref<2x8x128xf32, #tpu.memory_space<vmem>>, %arg2: memref<8x128xf32, #tpu.memory_space<vmem>>, %arg3: memref<128x128xbf16, #tpu.memory_space<vmem>>, %arg4: memref<128x128xbf16, #tpu.memory_space<vmem>>, %arg5: memref<1x128xf32, #tpu.memory_space<vmem>>, %arg6: memref<2x8x128xf32, #tpu.memory_space<vmem>>, %arg7: memref<8x128xf32, #tpu.memory_space<vmem>>, %arg8: memref<8x128xf32, #tpu.memory_space<vmem>>, %arg9: memref<2x8x128xf32, #tpu.memory_space<vmem>>) attributes {dimension_semantics = [#tpu.dimension_semantics<arbitrary>], iteration_bounds = array<i64: 4>, scalar_prefetch = 0 : i64, scratch_operands = 2 : i64, tpu.core_type = #tpu.core_type<tc>, window_params = [{transform_indices = @transform_0, window_bounds = array<i64: 2, 8, 128>}, {pipeline_mode = #tpu.pipeline_mode<synchronous>, transform_indices = @transform_1, window_bounds = array<i64: 8, 128>}, {pipeline_mode = #tpu.pipeline_mode<synchronous>, transform_indices = @transform_2, window_bounds = array<i64: 128, 128>}, {pipeline_mode = #tpu.pipeline_mode<synchronous>, transform_indices = @transform_3, window_bounds = array<i64: 128, 128>}, {pipeline_mode = #tpu.pipeline_mode<synchronous>, transform_indices = @transform_4, window_bounds = array<i64: 1, 128>}, {transform_indices = @transform_5, window_bounds = array<i64: 2, 8, 128>}, {pipeline_mode = #tpu.pipeline_mode<synchronous>, transform_indices = @transform_6, window_bounds = array<i64: 8, 128>}]} {
    %c0_i32 = arith.constant 0 : i32
    %0 = arith.cmpi eq, %arg0, %c0_i32 : i32
    %1 = arith.extui %0 : i1 to i32
    %c0_i32_0 = arith.constant 0 : i32
    %2 = arith.cmpi ne, %1, %c0_i32_0 : i32
    scf.if %2 {
      %c0_28 = arith.constant 0 : index
      %c0_29 = arith.constant 0 : index
      %41 = vector.load %arg2[%c0_28, %c0_29] : memref<8x128xf32, #tpu.memory_space<vmem>>, vector<8x128xf32>
      %c0_30 = arith.constant 0 : index
      %c0_31 = arith.constant 0 : index
      %42 = vector.load %arg8[%c0_30, %c0_31] : memref<8x128xf32, #tpu.memory_space<vmem>>, vector<8x128xf32>
      tpu.vector_store %arg8[%c0_30, %c0_31], %41 {strides = array<i32>} : memref<8x128xf32, #tpu.memory_space<vmem>>, vector<8x128xf32>,
    } else {
    }
    %c0 = arith.constant 0 : index
    %c0_1 = arith.constant 0 : index
    %3 = vector.load %arg3[%c0, %c0_1] : memref<128x128xbf16, #tpu.memory_space<vmem>>, vector<128x128xbf16>
    %c0_2 = arith.constant 0 : index
    %c0_3 = arith.constant 0 : index
    %4 = vector.load %arg8[%c0_2, %c0_3] : memref<8x128xf32, #tpu.memory_space<vmem>>, vector<8x128xf32>
    %c0_i32_4 = arith.constant 0 : i32
    %5 = arith.index_cast %c0_i32_4 : i32 to index
    %c0_5 = arith.constant 0 : index
    %c0_6 = arith.constant 0 : index
    %6 = vector.load %arg1[%5, %c0_5, %c0_6] : memref<2x8x128xf32, #tpu.memory_space<vmem>>, vector<1x8x128xf32>
    %7 = vector.shape_cast %6 : vector<1x8x128xf32> to vector<8x128xf32>
    %8 = arith.truncf %4 : vector<8x128xf32> to vector<8x128xbf16>
    %cst = arith.constant dense<0.000000e+00> : vector<8x128xf32>
    %9 = tpu.matmul %8, %3, %cst {dimension_numbers = #tpu.dot_dimension_numbers<[1], [0], [0], [1], [0, 0, 1, 1], [], []>} : vector<8x128xbf16>, vector<128x128xbf16>, vector<8x128xf32> -> vector<8x128xf32>
    %10 = arith.addf %7, %9 : vector<8x128xf32>
    %11 = math.tanh %10 : vector<8x128xf32>
    %12 = arith.index_cast %c0_i32_4 : i32 to index
    %c0_7 = arith.constant 0 : index
    %c0_8 = arith.constant 0 : index
    %13 = vector.load %arg9[%12, %c0_7, %c0_8] : memref<2x8x128xf32, #tpu.memory_space<vmem>>, vector<1x8x128xf32>
    %14 = vector.shape_cast %13 : vector<1x8x128xf32> to vector<8x128xf32>
    %15 = vector.shape_cast %11 : vector<8x128xf32> to vector<1x8x128xf32>
    tpu.vector_store %arg9[%12, %c0_7, %c0_8], %15 {strides = array<i32>} : memref<2x8x128xf32, #tpu.memory_space<vmem>>, vector<1x8x128xf32>,
    %c1_i32 = arith.constant 1 : i32
    %16 = arith.index_cast %c1_i32 : i32 to index
    %c0_9 = arith.constant 0 : index
    %c0_10 = arith.constant 0 : index
    %17 = vector.load %arg1[%16, %c0_9, %c0_10] : memref<2x8x128xf32, #tpu.memory_space<vmem>>, vector<1x8x128xf32>
    %18 = vector.shape_cast %17 : vector<1x8x128xf32> to vector<8x128xf32>
    %19 = arith.truncf %11 : vector<8x128xf32> to vector<8x128xbf16>
    %cst_11 = arith.constant dense<0.000000e+00> : vector<8x128xf32>
    %20 = tpu.matmul %19, %3, %cst_11 {dimension_numbers = #tpu.dot_dimension_numbers<[1], [0], [0], [1], [0, 0, 1, 1], [], []>} : vector<8x128xbf16>, vector<128x128xbf16>, vector<8x128xf32> -> vector<8x128xf32>
    %21 = arith.addf %18, %20 : vector<8x128xf32>
    %22 = math.tanh %21 : vector<8x128xf32>
    %23 = arith.index_cast %c1_i32 : i32 to index
    %c0_12 = arith.constant 0 : index
    %c0_13 = arith.constant 0 : index
    %24 = vector.load %arg9[%23, %c0_12, %c0_13] : memref<2x8x128xf32, #tpu.memory_space<vmem>>, vector<1x8x128xf32>
    %25 = vector.shape_cast %24 : vector<1x8x128xf32> to vector<8x128xf32>
    %26 = vector.shape_cast %22 : vector<8x128xf32> to vector<1x8x128xf32>
    tpu.vector_store %arg9[%23, %c0_12, %c0_13], %26 {strides = array<i32>} : memref<2x8x128xf32, #tpu.memory_space<vmem>>, vector<1x8x128xf32>,
    %c2_i32 = arith.constant 2 : i32
    %c0_14 = arith.constant 0 : index
    %c0_15 = arith.constant 0 : index
    %27 = vector.load %arg8[%c0_14, %c0_15] : memref<8x128xf32, #tpu.memory_space<vmem>>, vector<8x128xf32>
    tpu.vector_store %arg8[%c0_14, %c0_15], %22 {strides = array<i32>} : memref<8x128xf32, #tpu.memory_space<vmem>>, vector<8x128xf32>,
    %c0_16 = arith.constant 0 : index
    %c0_17 = arith.constant 0 : index
    %c0_18 = arith.constant 0 : index
    %28 = vector.load %arg9[%c0_16, %c0_17, %c0_18] : memref<2x8x128xf32, #tpu.memory_space<vmem>>, vector<2x8x128xf32>
    %29 = vector.shape_cast %28 : vector<2x8x128xf32> to vector<16x128xf32>
    %30 = arith.truncf %29 : vector<16x128xf32> to vector<16x128xbf16>
    %c0_19 = arith.constant 0 : index
    %c0_20 = arith.constant 0 : index
    %31 = vector.load %arg4[%c0_19, %c0_20] : memref<128x128xbf16, #tpu.memory_space<vmem>>, vector<128x128xbf16>
    %cst_21 = arith.constant dense<0.000000e+00> : vector<16x128xf32>
    %32 = tpu.matmul %30, %31, %cst_21 {dimension_numbers = #tpu.dot_dimension_numbers<[1], [0], [0], [1], [0, 0, 1, 1], [], []>} : vector<16x128xbf16>, vector<128x128xbf16>, vector<16x128xf32> -> vector<16x128xf32>
    %c0_22 = arith.constant 0 : index
    %c0_23 = arith.constant 0 : index
    %33 = vector.load %arg5[%c0_22, %c0_23] : memref<1x128xf32, #tpu.memory_space<vmem>>, vector<1x128xf32>
    %34 = vector.broadcast %33 : vector<1x128xf32> to vector<16x128xf32>
    %35 = arith.addf %32, %34 : vector<16x128xf32>
    %36 = vector.shape_cast %35 : vector<16x128xf32> to vector<2x8x128xf32>
    %c0_24 = arith.constant 0 : index
    %c0_25 = arith.constant 0 : index
    %c0_26 = arith.constant 0 : index
    %37 = vector.load %arg6[%c0_24, %c0_25, %c0_26] : memref<2x8x128xf32, #tpu.memory_space<vmem>>, vector<2x8x128xf32>
    tpu.vector_store %arg6[%c0_24, %c0_25, %c0_26], %36 {strides = array<i32>} : memref<2x8x128xf32, #tpu.memory_space<vmem>>, vector<2x8x128xf32>,
    %c3_i32 = arith.constant 3 : i32
    %38 = arith.cmpi eq, %arg0, %c3_i32 : i32
    %39 = arith.extui %38 : i1 to i32
    %c0_i32_27 = arith.constant 0 : i32
    %40 = arith.cmpi ne, %39, %c0_i32_27 : i32
    scf.if %40 {
      %c0_28 = arith.constant 0 : index
      %c0_29 = arith.constant 0 : index
      %41 = vector.load %arg7[%c0_28, %c0_29] : memref<8x128xf32, #tpu.memory_space<vmem>>, vector<8x128xf32>
      tpu.vector_store %arg7[%c0_28, %c0_29], %22 {strides = array<i32>} : memref<8x128xf32, #tpu.memory_space<vmem>>, vector<8x128xf32>,
    } else {
    }
    return
  }
  func.func @transform_0(%arg0: i32) -> (i32, i32, i32) {
    %c0_i32 = arith.constant 0 : i32
    %c0_i32_0 = arith.constant 0 : i32
    %c0_i32_1 = arith.constant 0 : i32
    return %arg0, %c0_i32, %c0_i32_0 : i32, i32, i32
  }
  func.func @transform_1(%arg0: i32) -> (i32, i32) {
    %c0_i32 = arith.constant 0 : i32
    %c0_i32_0 = arith.constant 0 : i32
    %c0_i32_1 = arith.constant 0 : i32
    return %c0_i32, %c0_i32_0 : i32, i32
  }
  func.func @transform_2(%arg0: i32) -> (i32, i32) {
    %c0_i32 = arith.constant 0 : i32
    %c0_i32_0 = arith.constant 0 : i32
    %c0_i32_1 = arith.constant 0 : i32
    return %c0_i32, %c0_i32_0 : i32, i32
  }
  func.func @transform_3(%arg0: i32) -> (i32, i32) {
    %c0_i32 = arith.constant 0 : i32
    %c0_i32_0 = arith.constant 0 : i32
    %c0_i32_1 = arith.constant 0 : i32
    return %c0_i32, %c0_i32_0 : i32, i32
  }
  func.func @transform_4(%arg0: i32) -> (i32, i32) {
    %c0_i32 = arith.constant 0 : i32
    %c0_i32_0 = arith.constant 0 : i32
    %c0_i32_1 = arith.constant 0 : i32
    return %c0_i32, %c0_i32_0 : i32, i32
  }
  func.func @transform_5(%arg0: i32) -> (i32, i32, i32) {
    %c0_i32 = arith.constant 0 : i32
    %c0_i32_0 = arith.constant 0 : i32
    %c0_i32_1 = arith.constant 0 : i32
    return %arg0, %c0_i32, %c0_i32_0 : i32, i32, i32
  }
  func.func @transform_6(%arg0: i32) -> (i32, i32) {
    %c0_i32 = arith.constant 0 : i32
    %c0_i32_0 = arith.constant 0 : i32
    %c0_i32_1 = arith.constant 0 : i32
    return %c0_i32, %c0_i32_0 : i32, i32
  }
}

</mosaic_0001>

<bundles_post_ra>
// kernel: char_rnn_forward.1
= control target key start
LH: loop header
LB: loop body
LE: loop exit
PB: predicated region body
PF: predicated region fallthrough
CT: control target
= control target key end

     0   :  { %s667_s21 = smov 0   ;;  %s754_s0 = inlined_call_operand.vmem [shape: f32[8,8,128], index: 0, kind: input, shape index: {}]   ;;  %s755_s1 = inlined_call_operand.vmem [shape: f32[8,128], index: 1, kind: input, shape index: {}]   ;;  %s756_s2 = inlined_call_operand.vmem [shape: bf16[128,128], index: 2, kind: input, shape index: {}]   ;;  %s757_s3 = inlined_call_operand.vmem [shape: bf16[128,128], index: 3, kind: input, shape index: {}]   ;;  %s758_s4 = inlined_call_operand.vmem [shape: f32[1,128], index: 4, kind: input, shape index: {}]   ;;  %s759_s5 = inlined_call_operand.vmem [shape: f32[8,8,128], index: 5, kind: output, shape index: {0}]   ;;  %s760_s6 = inlined_call_operand.vmem [shape: f32[8,128], index: 6, kind: output, shape index: {1}]  }
   0x1 LB: > { %s673_s22 = sadd.s32 4294967295, %s630_s21   ;;  %p521_p0 = scmp.ge.s32.totalorder %s630_s21, 1  ;;  %s630_s21 = sphi %s667_s21, %s17_s21  }
   0x2   : > { %p211_p1 = scmp.lt.s32.totalorder %s630_s21, 5 }
   0x4   : > { %p212_p2 = pnand %p521_p0, %p211_p1 }
   0x5   : > { %s522_s23 = sshll.u32 (!%p212_p2), %s673_s22, 1  ;;  %p526_p4 = scmp.ne.s32.totalorder (!%p212_p2), %s673_s22, 0 }
   0x6   : > { %215 = sbr.rel (%p212_p2) target bundleno = 468 (0x1d4), region = 40  ;;  %p242_p3 = scmp.lt.s32.totalorder (!%p212_p2), %s522_s23, 7 }
   0xb   : > { %s762_s23 = smov (!%p242_p3, %s522_s23), 7  ;;  %256 = sbr.rel (%p526_p4) target bundleno = 18 (0x12), region = 44 }
   0xc   : > { %s523_s24 = sshll.u32 %s762_s23, 3 }
   0xd   : > { %s681_s27 = scalar_lea.vmem %s754_s0, %s523_s24  ;;  %s686_s30 = scalar_lea.vmem %s759_s5, %s523_s24 }
  0x10   : > { %v257_v0 = vld [vmem:[%s755_s1] sm:$0xff] }
  0x11   : > { %258 = vst [vmem:[#allocation2] sm:$0xff] %v257_v0 }
  0x12 PF: > { %v602_v1 = vld [vmem:[%s756_s2 + $0x38] sm:$0xff]  ;;  %v601_v2 = vld [vmem:[%s756_s2 + $0x30] sm:$0xff]  ;;  %v600_v3 = vld [vmem:[%s756_s2 + $0x28] sm:$0xff]  ;;  %p592_p5 = scmp.ne.s32.totalorder %s673_s22, 3 }
  0x13   : > { %326 = vmatpush.bf16.msra.mxu0 %v602_v1  ;;  %345 = vmatpush.bf16.msra.mxu1 %v602_v1  ;;  %v599_v4 = vld [vmem:[%s756_s2 + $0x20] sm:$0xff]  ;;  %v598_v5 = vld [vmem:[%s756_s2 + $0x18] sm:$0xff]  ;;  %v597_v6 = vld [vmem:[%s756_s2 + $0x10] sm:$0xff] }
  0x14   : > { %v596_v7 = vld [vmem:[%s756_s2 + $0x8] sm:$0xff]  ;;  %v595_v8 = vld [vmem:[%s756_s2] sm:$0xff]  ;;  %v610_v11 = vld [vmem:[%s757_s3 + $0x38] sm:$0xff] }
  0x15   : > { %434 = vmatpush.bf16.msra.mxu2 %v610_v11  ;;  %v609_v12 = vld [vmem:[%s757_s3 + $0x30] sm:$0xff]  ;;  %v608_v13 = vld [vmem:[%s757_s3 + $0x28] sm:$0xff]  ;;  %v607_v14 = vld [vmem:[%s757_s3 + $0x20] sm:$0xff] }
  0x16   : > { %v606_v15 = vld [vmem:[%s757_s3 + $0x18] sm:$0xff]  ;;  %v276_v16 = vld [vmem:[%s681_s27] sm:$0xff]  ;;  %v605_v22 = vld [vmem:[%s757_s3 + $0x10] sm:$0xff] }
  0x17   : > { %327 = vmatpush.bf16.msra.mxu0 %v601_v2  ;;  %346 = vmatpush.bf16.msra.mxu1 %v601_v2  ;;  %v604_v23 = vld [vmem:[%s757_s3 + $0x8] sm:$0xff]  ;;  %v603_v24 = vld [vmem:[%s757_s3] sm:$0xff] }
  0x18   : > { %v275_v9 = vld [vmem:[#allocation2] sm:$0xff]  ;;  %v559_v25 = vld [vmem:[%s681_s27 + $0x8] sm:$0xff] }
  0x19   : > { %v277_v10 = vpack.c.bf16 %v275_v9, %v275_v9  ;;  %435 = vmatpush.bf16.msra.mxu2 %v609_v12  ;;  %v619_v31 = vld [vmem:[%s758_s4] ss:$0 sm:$0xff] }
  0x1b   : > { %328 = vmatpush.bf16.msra.mxu0 %v600_v3  ;;  %347 = vmatpush.bf16.msra.mxu1 %v600_v3 }
  0x1d   : > { %436 = vmatpush.bf16.msra.mxu2 %v608_v13 }
  0x1f   : > { %329 = vmatpush.bf16.msra.mxu0 %v599_v4  ;;  %348 = vmatpush.bf16.msra.mxu1 %v599_v4 }
  0x21   : > { %437 = vmatpush.bf16.msra.mxu2 %v607_v14 }
  0x23   : > { %330 = vmatpush.bf16.msra.mxu0 %v598_v5  ;;  %349 = vmatpush.bf16.msra.mxu1 %v598_v5 }
  0x25   : > { %438 = vmatpush.bf16.msra.mxu2 %v606_v15 }
  0x27   : > { %331 = vmatpush.bf16.msra.mxu0 %v597_v6  ;;  %350 = vmatpush.bf16.msra.mxu1 %v597_v6 }
  0x29   : > { %439 = vmatpush.bf16.msra.mxu2 %v605_v22 }
  0x2b   : > { %332 = vmatpush.bf16.msra.mxu0 %v596_v7  ;;  %351 = vmatpush.bf16.msra.mxu1 %v596_v7 }
  0x2d   : > { %440 = vmatpush.bf16.msra.mxu2 %v604_v23 }
  0x2f   : > { %333 = vmatpush.bf16.msra.mxu0 %v595_v8  ;;  %352 = vmatpush.bf16.msra.mxu1 %v595_v8 }
  0x31   : > { %441 = vmatpush.bf16.msra.mxu2 %v603_v24 }
  0x32   : > { %334 = vmatmul.bf16.vlgmr.msra.gmra.mxu0 %v277_v10 }
  0xaf   : > { %v335_v17 = vpop.f32.mrf.mxu0 }
  0xb0   : > { %v339_v18 = vadd.f32 %v335_v17, %v276_v16 }
  0xb2   : > { %620 = vtanh.f32 %v339_v18 }
  0xb7   : > { %v337_v19 = vpop.f32.mrf.mxu0 }
  0xb8   : > { %v621_v20 = vpop.eup %620 }
  0xb9   : > { %v344_v21 = vpack.c.bf16 %v621_v20, %v621_v20 }
  0xbb   : > { %353 = vmatmul.bf16.vlgmr.msra.gmra.mxu1 %v344_v21 }
 0x138   : > { %v354_v26 = vpop.f32.mrf.mxu1 }
 0x139   : > { %v358_v27 = vadd.f32 %v559_v25, %v354_v26 }
 0x13b   : > { %622 = vtanh.f32 %v358_v27 }
 0x140   : > { %v356_v28 = vpop.f32.mrf.mxu1 }
 0x141   : > { %v623_v29 = vpop.eup %622 }
 0x142   : > { %362 = vst [vmem:[#allocation2] sm:$0xff] %v623_v29  ;;  %v365_v30 = vpack.c.bf16 %v623_v29, %v621_v20 }
 0x144   : > { %442 = vmatmul.bf16.vlgmr.msra.gmra.mxu2 %v365_v30 }
 0x1c7   : > { %v443_v32 = vpop.f32.mrf.mxu2 }
 0x1c8   : > { %v444_v33 = vadd.f32 %v619_v31, %v443_v32 }
 0x1ca   : > { %448 = vst [vmem:[%s686_s30] sm:$0xff] %v444_v33 }
 0x1ce   : > { %453 = sbr.rel (%p592_p5) target bundleno = 468 (0x1d4), region = 48 }
 0x1cf   : > { %v445_v34 = vpop.f32.mrf.mxu2 }
 0x1d0   : > { %v446_v35 = vadd.f32 %v619_v31, %v445_v34 }
 0x1d2   : > { %449 = vst [vmem:[%s686_s30 + $0x8] sm:$0xff] %v446_v35 }
 0x1d3   : > { %454 = vst [vmem:[%s760_s6] sm:$0xff] %v623_v29 }
 0x1d4 PF: > { %s17_s21 = sadd.s32 1, %s630_s21  }
 0x1d5   : > { %p14_p6 = scmp.ge.s32.totalorder %s17_s21, 6  }
 0x1d7   :  { %16 = sbr.rel (!%p14_p6) target bundleno = 1 (0x1), region = 88 }

</bundles_post_ra>
